<compile_context>
chip_gen: v5e
topology: v5e:2x2
jax: 0.10.0
libtpu: 0.0.40
codegen_flags: <defaults>
</compile_context>

<pallas_src>
import functools

import numpy as np
import jax
import jax.numpy as jnp
from jax.experimental import pallas as pl
from jax.experimental.pallas import tpu as pltpu


# ----------------------------------------------------------------------------
# Generation-aware scoped-VMEM budget (review: bigger on v5e/v6e, capped on v7x)
# ----------------------------------------------------------------------------
def _vmem_limit_bytes():
    try:
        cap = int(pltpu.get_tpu_info().vmem_capacity_bytes)
        return max(32 << 20, min(96 << 20, (cap * 3) // 8))
    except Exception:  # no TPU attached / interpret mode
        return 32 << 20


# ----------------------------------------------------------------------------
# Stride-phase (sub-pixel) decomposition plan for ConvTranspose2d.
# Output position y = s*th + rh only receives kernel taps kh with
# (rh + p - kh) % s == 0, reading input row i = th + (rh + p - kh)//s.
# ----------------------------------------------------------------------------
def _phase_plan(KH, KW, stride, padding, output_padding, H, W):
    s, p = stride, padding
    Ho = (H - 1) * s - 2 * p + KH + output_padding
    Wo = (W - 1) * s - 2 * p + KW + output_padding
    # TODO(synk): general Ho/Wo not divisible by stride needs per-phase row counts.
    assert Ho % s == 0 and Wo % s == 0, (Ho, Wo, s)
    Ho_s, Wo_s = Ho // s, Wo // s

    def axis_plan(K, n_in, n_out_s):
        taps = []
        for r in range(s):
            taps.append([(k, (r + p - k) // s)
                         for k in range(K) if (r + p - k) % s == 0])
        all_d = [d for tl in taps for (_, d) in tl]
        lo = max(0, -min(all_d)) if all_d else 0
        hi = max(0, (n_out_s - 1) + (max(all_d) if all_d else 0) - (n_in - 1))
        return taps, lo, hi

    h_taps, pad_t, pad_b = axis_plan(KH, H, Ho_s)
    w_taps, pad_l, pad_r = axis_plan(KW, W, Wo_s)

    t_max = max(max(len(h_taps[rh]) * len(w_taps[rw])
                    for rh in range(s) for rw in range(s)), 1)
    offs = np.zeros((s * s, t_max, 2), dtype=np.int32)
    taps = []
    for rh in range(s):
        for rw in range(s):
            ph, lst, a = rh * s + rw, [], 0
            for kh, dh in h_taps[rh]:
                for kw, dw in w_taps[rw]:
                    offs[ph, a] = (dh + pad_t, dw + pad_l)
                    lst.append((kh, kw))
                    a += 1
            # phantom taps (zero weight) reuse the first real tap's offsets (always
            # in-bounds, never multiplied into the result)
            for b in range(a, t_max):
                offs[ph, b] = offs[ph, 0] if a > 0 else (0, 0)
            taps.append(lst)
    return dict(s=s, Ho=Ho, Wo=Wo, Ho_s=Ho_s, Wo_s=Wo_s, t_max=t_max,
                pads=((pad_t, pad_b), (pad_l, pad_r)), offs=offs, taps=taps)


def _phase_weights(weight, plan, Cin, Cout):
    """weight (Cin, Cout, KH, KW) -> (s*s, t_max*Cin, Cout) f32; phantom rows are 0."""
    t_max = plan["t_max"]
    mats = []
    for tap_list in plan["taps"]:
        rows = [weight[:, :, kh, kw] for (kh, kw) in tap_list]
        rows += [jnp.zeros((Cin, Cout), weight.dtype)] * (t_max - len(tap_list))
        mats.append(jnp.concatenate(rows, axis=0))
    return jnp.stack(mats, axis=0).astype(jnp.float32)


# ----------------------------------------------------------------------------
# Pallas kernel 1: phase-decomposed ConvTranspose2d (bias=False).
# One im2col MXU matmul per (batch, phase, output-row-tile) grid step.
# ----------------------------------------------------------------------------
def _make_phase_conv_kernel(t_max, Cin, tile_t, Wos):
    M = tile_t * Wos

    def kernel(offs_ref, x_ref, w_ref, o_ref, patch_ref):
        # offs_ref : SMEM (s*s, t_max, 2) int32 — scalar-prefetched tap offsets
        # x_ref    : (Hpad, Wpad, Cin) f32 — small un-dilated, edge-padded image
        # w_ref    : (t_max*Cin, Cout) f32 — per-phase weight slab (phantom rows = 0)
        # o_ref    : (Cout, M) bf16 — channels-first, lane-dense output slab
        # patch_ref: (M, t_max*Cin) f32 VMEM scratch (im2col patch)
        ph = pl.program_id(1)
        t = pl.program_id(2)
        row_base = t * tile_t
        for a in range(t_max):
            roff = offs_ref[ph, a, 0]
            coff = offs_ref[ph, a, 1]
            tap = x_ref[pl.ds(row_base + roff, tile_t), pl.ds(coff, Wos), :]
            patch_ref[:, a * Cin:(a + 1) * Cin] = tap.reshape(M, Cin)
        # ONE f32 x f32 MXU matmul per grid step (bf16 operands crash the CPU/interpret
        # dot runtime; see header TODO).
        acc = jnp.dot(patch_ref[...], w_ref[...],
                      preferred_element_type=jnp.float32)            # (M, Cout)
        o_ref[...] = jnp.transpose(acc, (1, 0)).astype(o_ref.dtype)  # (Cout, M)

    return kernel


def _pick_tile_rows(Ho_s, Wo_s, Cout, Kdim):
    """Largest divisor of Ho_s whose lane dim M = tile*Wo_s is 128-aligned (or the full
    per-phase extent), with multi-MiB caps (review: bigger tiles; prefer 256-aligned)."""
    budget = 4 << 20
    divs = [d for d in range(1, Ho_s + 1) if Ho_s % d == 0]
    cands = [d for d in divs if (d * Wo_s) % 128 == 0 or d == Ho_s]
    good = [d for d in cands
            if d * Wo_s * Kdim * 4 <= budget and d * Wo_s * Cout * 4 <= budget]
    pool = good if good else cands
    return max(pool, key=lambda d: ((d * Wo_s) % 256 == 0, (d * Wo_s) % 128 == 0, d))


def conv_transpose2d_phase_pallas(x_nhwc, weight, plan, out_dtype=jnp.bfloat16):
    Bk, H, W, Cin = x_nhwc.shape
    Cout = weight.shape[1]
    s = plan["s"]
    s2 = s * s
    Ho_s, Wo_s, t_max = plan["Ho_s"], plan["Wo_s"], plan["t_max"]
    (pad_t, pad_b), (pad_l, pad_r) = plan["pads"]

    # Small edge pad of the *un-dilated* input (no interior/zero insertion any more).
    x_pad = jnp.pad(x_nhwc.astype(jnp.float32),
                    ((0, 0), (pad_t, pad_b), (pad_l, pad_r), (0, 0)))
    Hpad, Wpad = x_pad.shape[1], x_pad.shape[2]
    w_ph = _phase_weights(weight, plan, Cin, Cout)         # (s2, Kdim, Cout)
    offs = jnp.asarray(plan["offs"])                       # (s2, t_max, 2) int32
    Kdim = t_max * Cin

    tile_t = _pick_tile_rows(Ho_s, Wo_s, Cout, Kdim)
    n_t = Ho_s // tile_t
    M = tile_t * Wo_s
    kernel = _make_phase_conv_kernel(t_max, Cin, tile_t, Wo_s)

    flops = 2 * Bk * s2 * n_t * M * Kdim * Cout
    bytes_accessed = int(x_pad.size * 4 + Bk * w_ph.size * 4
                         + Bk * s2 * Ho_s * Wo_s * Cout * jnp.dtype(out_dtype).itemsize)

    return pl.pallas_call(
        kernel,
        out_shape=jax.ShapeDtypeStruct((Bk, s2, Cout, Ho_s * Wo_s), out_dtype),
        grid_spec=pltpu.PrefetchScalarGridSpec(
            num_scalar_prefetch=1,
            grid=(Bk, s2, n_t),
            in_specs=[
                pl.BlockSpec((None, Hpad, Wpad, Cin), lambda b, ph, t, o: (b, 0, 0, 0)),
                pl.BlockSpec((None, Kdim, Cout), lambda b, ph, t, o: (ph, 0, 0)),
            ],
            out_specs=pl.BlockSpec((None, None, Cout, M),
                                   lambda b, ph, t, o: (b, ph, 0, t)),
            scratch_shapes=[pltpu.VMEM((M, Kdim), jnp.float32)],
        ),
        compiler_params=pltpu.CompilerParams(
            dimension_semantics=("parallel", "parallel", "parallel"),
            vmem_limit_bytes=_vmem_limit_bytes()),
        cost_estimate=pl.CostEstimate(flops=int(flops), transcendentals=0,
                                      bytes_accessed=bytes_accessed),
    )(offs, x_pad, w_ph)                                    # (Bk, s2, Cout, Ho_s*Wo_s)


# ----------------------------------------------------------------------------
# Pallas kernel 2: fused magnitude + BatchNorm affine + ReLU + rotation rescale.
#   mag  = relu(scale * 0.5*(||psi||_rot + chi) + shift)
#   res  = (psi + r_b) / (||psi + r_b||_rot + 1e-8) * mag
# ----------------------------------------------------------------------------
def _rescale_kernel(psi_ref, chi_ref, rb_ref, sc_ref, sh_ref, o_ref):
    psi = psi_ref[...].astype(jnp.float32)                      # (N, C, ts)
    z = psi + rb_ref[...]                                       # + (N, C, 1)
    mag = 0.5 * (jnp.sqrt(jnp.sum(psi * psi, axis=0))
                 + chi_ref[...].astype(jnp.float32))            # (C, ts)
    mag = jnp.maximum(mag * sc_ref[...] + sh_ref[...], 0.0)     # fused BN affine + ReLU
    zn = jnp.sqrt(jnp.sum(z * z, axis=0, keepdims=True))        # (1, C, ts)
    o_ref[...] = (z / (zn + 1e-8) * mag[None]).astype(o_ref.dtype)


def _pick_tile_s(S, N, C):
    budget = 8 << 20                       # review: raised cap; ts == S now considered
    cands = [d for d in range(128, S + 1, 128) if S % d == 0] + [S]
    good = [d for d in cands if (N + 2) * C * d * 4 <= budget]
    return max(good) if good else min(cands)


def rescale_pallas(psi, chi, rb, bn_scale, bn_shift):
    B, N, s2, C, S = psi.shape
    ts = _pick_tile_s(S, N, C)
    bytes_accessed = int(psi.size * psi.dtype.itemsize
                         + chi.size * chi.dtype.itemsize + psi.size * 4)
    return pl.pallas_call(
        _rescale_kernel,
        out_shape=jax.ShapeDtypeStruct((B, N, s2, C, S), jnp.float32),
        grid=(B, s2, S // ts),
        in_specs=[
            pl.BlockSpec((None, N, None, C, ts), lambda b, ph, j: (b, 0, ph, 0, j)),
            pl.BlockSpec((None, None, C, ts), lambda b, ph, j: (b, ph, 0, j)),
            pl.BlockSpec((N, C, 1), lambda b, ph, j: (0, 0, 0)),
            pl.BlockSpec((C, 1), lambda b, ph, j: (0, 0)),
            pl.BlockSpec((C, 1), lambda b, ph, j: (0, 0)),
        ],
        out_specs=pl.BlockSpec((None, N, None, C, ts), lambda b, ph, j: (b, 0, ph, 0, j)),
        compiler_params=pltpu.CompilerParams(
            dimension_semantics=("parallel", "parallel", "parallel"),
            vmem_limit_bytes=_vmem_limit_bytes()),
        cost_estimate=pl.CostEstimate(flops=int(12 * psi.size),
                                      transcendentals=int(2 * B * s2 * C * S),
                                      bytes_accessed=bytes_accessed),
    )(psi, chi, rb, bn_scale, bn_shift)


# ----------------------------------------------------------------------------
# Full forward (mirrors RotatingConvTranspose2d.forward)
# ----------------------------------------------------------------------------
@functools.partial(jax.jit, static_argnames=("stride", "padding", "output_padding"))
def rotating_conv_transpose2d(x, weight, r_b, gamma, beta, *, stride, padding,
                              output_padding):
    B, N, Cin, H, W = x.shape
    _, Cout, KH, KW = weight.shape
    plan = _phase_plan(KH, KW, stride, padding, output_padding, H, W)
    s = plan["s"]
    s2 = s * s
    Ho, Wo, Ho_s, Wo_s = plan["Ho"], plan["Wo"], plan["Ho_s"], plan["Wo_s"]
    S_ph = Ho_s * Wo_s

    # Fold rotation dim into batch; append the rotation-magnitude image ||x||_rot.
    x_folded = x.reshape(B * N, Cin, H, W)
    x_mag = jnp.sqrt(jnp.sum(jnp.square(x), axis=1))              # (B, Cin, H, W)
    conv_in = jnp.transpose(jnp.concatenate([x_folded, x_mag], axis=0), (0, 2, 3, 1))

    out = conv_transpose2d_phase_pallas(conv_in, weight, plan)    # (B*N+B, s2, Cout, S_ph)
    psi = out[:B * N].reshape(B, N, s2, Cout, S_ph)               # bf16, channels-first
    chi = out[B * N:]                                             # (B, s2, Cout, S_ph)

    # BatchNorm2d batch statistics on magnitude = 0.5*(||psi||_rot + chi). Only the
    # per-channel sums are produced here; the magnitude itself is recomputed inside the
    # rescale kernel, so the normalized magnitude never round-trips HBM.
    psi32 = psi.astype(jnp.float32)
    mag = 0.5 * (jnp.sqrt(jnp.sum(jnp.square(psi32), axis=1)) + chi.astype(jnp.float32))
    cnt = B * s2 * S_ph
    m1 = jnp.sum(mag, axis=(0, 1, 3)) / cnt
    m2 = jnp.sum(jnp.square(mag), axis=(0, 1, 3)) / cnt
    var = jnp.maximum(m2 - jnp.square(m1), 0.0)
    bn_scale = gamma * jax.lax.rsqrt(var + 1e-5)                  # (Cout,)
    bn_shift = beta - m1 * bn_scale
    # TODO(synk): BatchNorm running-stat buffer updates omitted (no effect on output).

    res_pm = rescale_pallas(psi, chi, r_b.reshape(N, Cout, 1),
                            bn_scale.reshape(Cout, 1), bn_shift.reshape(Cout, 1))
    # Un-interleave the stride phases into the final (Ho, Wo) raster (one XLA pass).
    res = res_pm.reshape(B, N, s, s, Cout, Ho_s, Wo_s)
    res = jnp.transpose(res, (0, 1, 4, 5, 2, 6, 3))
    return res.reshape(B, N, Cout, Ho, Wo)


# ----------------------------------------------------------------------------
# Pure-JAX reference (numerical verification). The conv runs in f32 (HIGHEST) and its
# output is rounded to bf16 to match the kernel's bf16 psi/chi storage.
# ----------------------------------------------------------------------------
def reference_forward(x, weight, r_b, gamma, beta, *, stride, padding, output_padding):
    B, N, Cin, H, W = x.shape
    _, Cout, KH, KW = weight.shape
    w_hwio = jnp.transpose(jnp.flip(weight, (2, 3)), (2, 3, 0, 1))

    def tconv(inp_nchw):
        inp = jnp.transpose(inp_nchw, (0, 2, 3, 1))
        out = jax.lax.conv_general_dilated(
            inp, w_hwio, window_strides=(1, 1),
            padding=((KH - 1 - padding, KH - 1 - padding + output_padding),
                     (KW - 1 - padding, KW - 1 - padding + output_padding)),
            lhs_dilation=(stride, stride), rhs_dilation=(1, 1),
            dimension_numbers=("NHWC", "HWIO", "NHWC"),
            precision=jax.lax.Precision.HIGHEST)
        return out.astype(jnp.bfloat16).astype(jnp.float32)

    psi = tconv(x.reshape(B * N, Cin, H, W))
    Ho, Wo = psi.shape[1], psi.shape[2]
    psi = psi.reshape(B, N, Ho, Wo, Cout)
    chi = tconv(jnp.sqrt(jnp.sum(jnp.square(x), axis=1)))
    z = psi + r_b.reshape(N, Cout)[None, :, None, None, :]
    mag = 0.5 * (jnp.sqrt(jnp.sum(jnp.square(psi), axis=1)) + chi)
    mean = jnp.mean(mag, axis=(0, 1, 2))
    var = jnp.var(mag, axis=(0, 1, 2))
    mag = jnp.maximum((mag - mean) * jax.lax.rsqrt(var + 1e-5) * gamma + beta, 0.0)
    zn = jnp.sqrt(jnp.sum(jnp.square(z), axis=1, keepdims=True))
    res = z / (zn + 1e-8) * mag[:, None]
    return jnp.transpose(res, (0, 1, 4, 2, 3))


if __name__ == "__main__":
    B, N, Cin, Cout, H, W = 2, 2, 4, 8, 8, 8
    K, stride, padding, output_padding = 3, 2, 1, 1

    key = jax.random.PRNGKey(0)
    kx, kw, kb = jax.random.split(key, 3)
    x = jax.random.normal(kx, (B, N, Cin, H, W), jnp.float32)
    wbound = 1.0 / (Cin * K * K) ** 0.5
    weight = jax.random.uniform(kw, (Cin, Cout, K, K), jnp.float32, -wbound, wbound)
    fan_in = Cout * K * K
    rbound = 1.0 / fan_in ** 0.5
    r_b = jax.random.uniform(kb, (1, N, Cout, 1, 1), jnp.float32, -rbound, rbound)
    gamma = jnp.ones((Cout,), jnp.float32)
    beta = jnp.zeros((Cout,), jnp.float32)

    out = rotating_conv_transpose2d(x, weight, r_b, gamma, beta, stride=stride,
                                    padding=padding, output_padding=output_padding)
    out = jax.block_until_ready(out)

    Ho = (H - 1) * stride - 2 * padding + K + output_padding
    assert out.shape == (B, N, Cout, Ho, Ho), out.shape

    ref = reference_forward(x, weight, r_b, gamma, beta, stride=stride,
                            padding=padding, output_padding=output_padding)
    err = float(jnp.max(jnp.abs(out - ref)))
    assert jnp.allclose(out, ref, rtol=2e-2, atol=2e-2), err

    print("KERNEL_OK")
</pallas_src>

<mosaic_0001>
module attributes {stable_mosaic.version = 11 : i64} {
  func.func @kernel(%arg0: i32, %arg1: i32, %arg2: i32, %arg3: memref<4x4x2xi32, #tpu.memory_space<smem>>, %arg4: memref<1x9x9x4xf32, #tpu.memory_space<vmem>>, %arg5: memref<1x16x8xf32, #tpu.memory_space<vmem>>, %arg6: memref<1x1x8x64xbf16, #tpu.memory_space<vmem>>, %arg7: memref<64x16xf32, #tpu.memory_space<vmem>>) attributes {dimension_semantics = [#tpu.dimension_semantics<parallel>, #tpu.dimension_semantics<parallel>, #tpu.dimension_semantics<parallel>], iteration_bounds = array<i64: 6, 4, 1>, scalar_prefetch = 1 : i64, scratch_operands = 1 : i64, tpu.core_type = #tpu.core_type<tc>, window_params = [{transform_indices = @transform_0, window_bounds = array<i64: 1, 9, 9, 4>}, {transform_indices = @transform_1, window_bounds = array<i64: 1, 16, 8>}, {transform_indices = @transform_2, window_bounds = array<i64: 1, 1, 8, 64>}]} {
    %c8_i32 = arith.constant 8 : i32
    %0 = arith.muli %arg2, %c8_i32 : i32
    %1 = arith.index_cast %arg1 : i32 to index
    %c0 = arith.constant 0 : index
    %c0_0 = arith.constant 0 : index
    %2 = memref.load %arg3[%1, %c0, %c0_0] : memref<4x4x2xi32, #tpu.memory_space<smem>>
    %3 = arith.index_cast %arg1 : i32 to index
    %c0_1 = arith.constant 0 : index
    %c1 = arith.constant 1 : index
    %4 = memref.load %arg3[%3, %c0_1, %c1] : memref<4x4x2xi32, #tpu.memory_space<smem>>
    %5 = arith.addi %0, %2 : i32
    %c0_2 = arith.constant 0 : index
    %6 = arith.index_cast %5 : i32 to index
    %7 = arith.index_cast %4 : i32 to index
    %c0_3 = arith.constant 0 : index
    %8 = vector.load %arg4[%c0_2, %6, %7, %c0_3] : memref<1x9x9x4xf32, #tpu.memory_space<vmem>>, vector<1x8x8x4xf32>
    %9 = vector.shape_cast %8 : vector<1x8x8x4xf32> to vector<8x8x4xf32>
    %10 = vector.shape_cast %9 : vector<8x8x4xf32> to vector<64x4xf32>
    %c0_4 = arith.constant 0 : index
    %c0_5 = arith.constant 0 : index
    %11 = vector.load %arg7[%c0_4, %c0_5] : memref<64x16xf32, #tpu.memory_space<vmem>>, vector<64x4xf32>
    tpu.vector_store %arg7[%c0_4, %c0_5], %10 {strides = array<i32>} : memref<64x16xf32, #tpu.memory_space<vmem>>, vector<64x4xf32>,
    %12 = arith.index_cast %arg1 : i32 to index
    %c1_6 = arith.constant 1 : index
    %c0_7 = arith.constant 0 : index
    %13 = memref.load %arg3[%12, %c1_6, %c0_7] : memref<4x4x2xi32, #tpu.memory_space<smem>>
    %14 = arith.index_cast %arg1 : i32 to index
    %c1_8 = arith.constant 1 : index
    %c1_9 = arith.constant 1 : index
    %15 = memref.load %arg3[%14, %c1_8, %c1_9] : memref<4x4x2xi32, #tpu.memory_space<smem>>
    %16 = arith.addi %0, %13 : i32
    %c0_10 = arith.constant 0 : index
    %17 = arith.index_cast %16 : i32 to index
    %18 = arith.index_cast %15 : i32 to index
    %c0_11 = arith.constant 0 : index
    %19 = vector.load %arg4[%c0_10, %17, %18, %c0_11] : memref<1x9x9x4xf32, #tpu.memory_space<vmem>>, vector<1x8x8x4xf32>
    %20 = vector.shape_cast %19 : vector<1x8x8x4xf32> to vector<8x8x4xf32>
    %21 = vector.shape_cast %20 : vector<8x8x4xf32> to vector<64x4xf32>
    %c0_12 = arith.constant 0 : index
    %c4 = arith.constant 4 : index
    %22 = vector.load %arg7[%c0_12, %c4] : memref<64x16xf32, #tpu.memory_space<vmem>>, vector<64x4xf32>
    tpu.vector_store %arg7[%c0_12, %c4], %21 {strides = array<i32>} : memref<64x16xf32, #tpu.memory_space<vmem>>, vector<64x4xf32>,
    %23 = arith.index_cast %arg1 : i32 to index
    %c2 = arith.constant 2 : index
    %c0_13 = arith.constant 0 : index
    %24 = memref.load %arg3[%23, %c2, %c0_13] : memref<4x4x2xi32, #tpu.memory_space<smem>>
    %25 = arith.index_cast %arg1 : i32 to index
    %c2_14 = arith.constant 2 : index
    %c1_15 = arith.constant 1 : index
    %26 = memref.load %arg3[%25, %c2_14, %c1_15] : memref<4x4x2xi32, #tpu.memory_space<smem>>
    %27 = arith.addi %0, %24 : i32
    %c0_16 = arith.constant 0 : index
    %28 = arith.index_cast %27 : i32 to index
    %29 = arith.index_cast %26 : i32 to index
    %c0_17 = arith.constant 0 : index
    %30 = vector.load %arg4[%c0_16, %28, %29, %c0_17] : memref<1x9x9x4xf32, #tpu.memory_space<vmem>>, vector<1x8x8x4xf32>
    %31 = vector.shape_cast %30 : vector<1x8x8x4xf32> to vector<8x8x4xf32>
    %32 = vector.shape_cast %31 : vector<8x8x4xf32> to vector<64x4xf32>
    %c0_18 = arith.constant 0 : index
    %c8 = arith.constant 8 : index
    %33 = vector.load %arg7[%c0_18, %c8] : memref<64x16xf32, #tpu.memory_space<vmem>>, vector<64x4xf32>
    tpu.vector_store %arg7[%c0_18, %c8], %32 {strides = array<i32>} : memref<64x16xf32, #tpu.memory_space<vmem>>, vector<64x4xf32>,
    %34 = arith.index_cast %arg1 : i32 to index
    %c3 = arith.constant 3 : index
    %c0_19 = arith.constant 0 : index
    %35 = memref.load %arg3[%34, %c3, %c0_19] : memref<4x4x2xi32, #tpu.memory_space<smem>>
    %36 = arith.index_cast %arg1 : i32 to index
    %c3_20 = arith.constant 3 : index
    %c1_21 = arith.constant 1 : index
    %37 = memref.load %arg3[%36, %c3_20, %c1_21] : memref<4x4x2xi32, #tpu.memory_space<smem>>
    %38 = arith.addi %0, %35 : i32
    %c0_22 = arith.constant 0 : index
    %39 = arith.index_cast %38 : i32 to index
    %40 = arith.index_cast %37 : i32 to index
    %c0_23 = arith.constant 0 : index
    %41 = vector.load %arg4[%c0_22, %39, %40, %c0_23] : memref<1x9x9x4xf32, #tpu.memory_space<vmem>>, vector<1x8x8x4xf32>
    %42 = vector.shape_cast %41 : vector<1x8x8x4xf32> to vector<8x8x4xf32>
    %43 = vector.shape_cast %42 : vector<8x8x4xf32> to vector<64x4xf32>
    %c0_24 = arith.constant 0 : index
    %c12 = arith.constant 12 : index
    %44 = vector.load %arg7[%c0_24, %c12] : memref<64x16xf32, #tpu.memory_space<vmem>>, vector<64x4xf32>
    tpu.vector_store %arg7[%c0_24, %c12], %43 {strides = array<i32>} : memref<64x16xf32, #tpu.memory_space<vmem>>, vector<64x4xf32>,
    %c0_25 = arith.constant 0 : index
    %c0_26 = arith.constant 0 : index
    %45 = vector.load %arg7[%c0_25, %c0_26] : memref<64x16xf32, #tpu.memory_space<vmem>>, vector<64x16xf32>
    %c0_27 = arith.constant 0 : index
    %c0_28 = arith.constant 0 : index
    %c0_29 = arith.constant 0 : index
    %46 = vector.load %arg5[%c0_27, %c0_28, %c0_29] : memref<1x16x8xf32, #tpu.memory_space<vmem>>, vector<1x16x8xf32>
    %47 = vector.shape_cast %46 : vector<1x16x8xf32> to vector<16x8xf32>
    %cst = arith.constant dense<0.000000e+00> : vector<64x8xf32>
    %48 = tpu.matmul %45, %47, %cst {dimension_numbers = #tpu.dot_dimension_numbers<[1], [0], [0], [1], [0, 0, 1, 1], [], []>} : vector<64x16xf32>, vector<16x8xf32>, vector<64x8xf32> -> vector<64x8xf32>
    %49 = tpu.transpose %48, [1, 0] : vector<64x8xf32> -> vector<8x64xf32>
    %50 = arith.truncf %49 : vector<8x64xf32> to vector<8x64xbf16>
    %c0_30 = arith.constant 0 : index
    %c0_31 = arith.constant 0 : index
    %c0_32 = arith.constant 0 : index
    %c0_33 = arith.constant 0 : index
    %51 = vector.load %arg6[%c0_30, %c0_31, %c0_32, %c0_33] : memref<1x1x8x64xbf16, #tpu.memory_space<vmem>>, vector<1x1x8x64xbf16>
    %52 = vector.shape_cast %51 : vector<1x1x8x64xbf16> to vector<8x64xbf16>
    %53 = vector.shape_cast %50 : vector<8x64xbf16> to vector<1x1x8x64xbf16>
    tpu.vector_store %arg6[%c0_30, %c0_31, %c0_32, %c0_33], %53 {strides = array<i32>} : memref<1x1x8x64xbf16, #tpu.memory_space<vmem>>, vector<1x1x8x64xbf16>,
    return
  }
  func.func @transform_0(%arg0: i32, %arg1: i32, %arg2: i32, %arg3: memref<4x4x2xi32, #tpu.memory_space<smem>>) -> (i32, i32, i32, i32) {
    %c0_i32 = arith.constant 0 : i32
    %c0_i32_0 = arith.constant 0 : i32
    %c0_i32_1 = arith.constant 0 : i32
    %c0_i32_2 = arith.constant 0 : i32
    return %arg0, %c0_i32, %c0_i32_0, %c0_i32_1 : i32, i32, i32, i32
  }
  func.func @transform_1(%arg0: i32, %arg1: i32, %arg2: i32, %arg3: memref<4x4x2xi32, #tpu.memory_space<smem>>) -> (i32, i32, i32) {
    %c0_i32 = arith.constant 0 : i32
    %c0_i32_0 = arith.constant 0 : i32
    %c0_i32_1 = arith.constant 0 : i32
    return %arg1, %c0_i32, %c0_i32_0 : i32, i32, i32
  }
  func.func @transform_2(%arg0: i32, %arg1: i32, %arg2: i32, %arg3: memref<4x4x2xi32, #tpu.memory_space<smem>>) -> (i32, i32, i32, i32) {
    %c0_i32 = arith.constant 0 : i32
    %c0_i32_0 = arith.constant 0 : i32
    return %arg0, %arg1, %c0_i32, %arg2 : i32, i32, i32, i32
  }
}

module attributes {stable_mosaic.version = 11 : i64} {
  func.func @_rescale_kernel(%arg0: i32, %arg1: i32, %arg2: i32, %arg3: memref<1x2x1x8x64xbf16, #tpu.memory_space<vmem>>, %arg4: memref<1x1x8x64xbf16, #tpu.memory_space<vmem>>, %arg5: memref<2x8x1xf32, #tpu.memory_space<vmem>>, %arg6: memref<8x1xf32, #tpu.memory_space<vmem>>, %arg7: memref<8x1xf32, #tpu.memory_space<vmem>>, %arg8: memref<1x2x1x8x64xf32, #tpu.memory_space<vmem>>) attributes {dimension_semantics = [#tpu.dimension_semantics<parallel>, #tpu.dimension_semantics<parallel>, #tpu.dimension_semantics<parallel>], iteration_bounds = array<i64: 2, 4, 1>, scalar_prefetch = 0 : i64, scratch_operands = 0 : i64, tpu.core_type = #tpu.core_type<tc>, window_params = [{transform_indices = @transform_0, window_bounds = array<i64: 1, 2, 1, 8, 64>}, {transform_indices = @transform_1, window_bounds = array<i64: 1, 1, 8, 64>}, {pipeline_mode = #tpu.pipeline_mode<synchronous>, transform_indices = @transform_2, window_bounds = array<i64: 2, 8, 1>}, {pipeline_mode = #tpu.pipeline_mode<synchronous>, transform_indices = @transform_3, window_bounds = array<i64: 8, 1>}, {pipeline_mode = #tpu.pipeline_mode<synchronous>, transform_indices = @transform_4, window_bounds = array<i64: 8, 1>}, {transform_indices = @transform_5, window_bounds = array<i64: 1, 2, 1, 8, 64>}]} {
    %c0 = arith.constant 0 : index
    %c0_0 = arith.constant 0 : index
    %c0_1 = arith.constant 0 : index
    %c0_2 = arith.constant 0 : index
    %c0_3 = arith.constant 0 : index
    %0 = vector.load %arg3[%c0, %c0_0, %c0_1, %c0_2, %c0_3] : memref<1x2x1x8x64xbf16, #tpu.memory_space<vmem>>, vector<1x2x1x8x64xbf16>
    %1 = vector.shape_cast %0 : vector<1x2x1x8x64xbf16> to vector<2x8x64xbf16>
    %2 = arith.extf %1 : vector<2x8x64xbf16> to vector<2x8x64xf32>
    %c0_4 = arith.constant 0 : index
    %c0_5 = arith.constant 0 : index
    %c0_6 = arith.constant 0 : index
    %3 = vector.load %arg5[%c0_4, %c0_5, %c0_6] : memref<2x8x1xf32, #tpu.memory_space<vmem>>, vector<2x8x1xf32>
    %4 = vector.broadcast %3 : vector<2x8x1xf32> to vector<2x8x64xf32>
    %5 = arith.addf %2, %4 : vector<2x8x64xf32>
    %6 = arith.mulf %2, %2 : vector<2x8x64xf32>
    %cst = arith.constant dense<0.000000e+00> : vector<8x64xf32>
    %7 = vector.multi_reduction <add>, %6, %cst [0] : vector<2x8x64xf32> to vector<8x64xf32>
    %8 = math.sqrt %7 : vector<8x64xf32>
    %c0_7 = arith.constant 0 : index
    %c0_8 = arith.constant 0 : index
    %c0_9 = arith.constant 0 : index
    %c0_10 = arith.constant 0 : index
    %9 = vector.load %arg4[%c0_7, %c0_8, %c0_9, %c0_10] : memref<1x1x8x64xbf16, #tpu.memory_space<vmem>>, vector<1x1x8x64xbf16>
    %10 = vector.shape_cast %9 : vector<1x1x8x64xbf16> to vector<8x64xbf16>
    %11 = arith.extf %10 : vector<8x64xbf16> to vector<8x64xf32>
    %12 = arith.addf %8, %11 : vector<8x64xf32>
    %cst_11 = arith.constant 5.000000e-01 : f32
    %13 = vector.broadcast %cst_11 : f32 to vector<8x64xf32>
    %14 = arith.mulf %13, %12 : vector<8x64xf32>
    %c0_12 = arith.constant 0 : index
    %c0_13 = arith.constant 0 : index
    %15 = vector.load %arg6[%c0_12, %c0_13] : memref<8x1xf32, #tpu.memory_space<vmem>>, vector<8x1xf32>
    %16 = vector.broadcast %15 : vector<8x1xf32> to vector<8x64xf32>
    %17 = arith.mulf %14, %16 : vector<8x64xf32>
    %c0_14 = arith.constant 0 : index
    %c0_15 = arith.constant 0 : index
    %18 = vector.load %arg7[%c0_14, %c0_15] : memref<8x1xf32, #tpu.memory_space<vmem>>, vector<8x1xf32>
    %19 = vector.broadcast %18 : vector<8x1xf32> to vector<8x64xf32>
    %20 = arith.addf %17, %19 : vector<8x64xf32>
    %cst_16 = arith.constant 0.000000e+00 : f32
    %21 = vector.broadcast %cst_16 : f32 to vector<8x64xf32>
    %22 = arith.maximumf %20, %21 : vector<8x64xf32>
    %23 = arith.mulf %5, %5 : vector<2x8x64xf32>
    %cst_17 = arith.constant dense<0.000000e+00> : vector<8x64xf32>
    %24 = vector.multi_reduction <add>, %23, %cst_17 [0] : vector<2x8x64xf32> to vector<8x64xf32>
    %25 = vector.shape_cast %24 : vector<8x64xf32> to vector<1x8x64xf32>
    %26 = math.sqrt %25 : vector<1x8x64xf32>
    %cst_18 = arith.constant 9.99999993E-9 : f32
    %27 = vector.broadcast %cst_18 : f32 to vector<1x8x64xf32>
    %28 = arith.addf %26, %27 : vector<1x8x64xf32>
    %29 = vector.broadcast %28 : vector<1x8x64xf32> to vector<2x8x64xf32>
    %30 = arith.divf %5, %29 : vector<2x8x64xf32>
    %31 = vector.shape_cast %22 : vector<8x64xf32> to vector<1x8x64xf32>
    %32 = vector.broadcast %31 : vector<1x8x64xf32> to vector<2x8x64xf32>
    %33 = arith.mulf %30, %32 : vector<2x8x64xf32>
    %c0_19 = arith.constant 0 : index
    %c0_20 = arith.constant 0 : index
    %c0_21 = arith.constant 0 : index
    %c0_22 = arith.constant 0 : index
    %c0_23 = arith.constant 0 : index
    %34 = vector.load %arg8[%c0_19, %c0_20, %c0_21, %c0_22, %c0_23] : memref<1x2x1x8x64xf32, #tpu.memory_space<vmem>>, vector<1x2x1x8x64xf32>
    %35 = vector.shape_cast %34 : vector<1x2x1x8x64xf32> to vector<2x8x64xf32>
    %36 = vector.shape_cast %33 : vector<2x8x64xf32> to vector<1x2x1x8x64xf32>
    tpu.vector_store %arg8[%c0_19, %c0_20, %c0_21, %c0_22, %c0_23], %36 {strides = array<i32>} : memref<1x2x1x8x64xf32, #tpu.memory_space<vmem>>, vector<1x2x1x8x64xf32>,
    return
  }
  func.func @transform_0(%arg0: i32, %arg1: i32, %arg2: i32) -> (i32, i32, i32, i32, i32) {
    %c0_i32 = arith.constant 0 : i32
    %c0_i32_0 = arith.constant 0 : i32
    %c0_i32_1 = arith.constant 0 : i32
    return %arg0, %c0_i32, %arg1, %c0_i32_0, %arg2 : i32, i32, i32, i32, i32
  }
  func.func @transform_1(%arg0: i32, %arg1: i32, %arg2: i32) -> (i32, i32, i32, i32) {
    %c0_i32 = arith.constant 0 : i32
    %c0_i32_0 = arith.constant 0 : i32
    return %arg0, %arg1, %c0_i32, %arg2 : i32, i32, i32, i32
  }
  func.func @transform_2(%arg0: i32, %arg1: i32, %arg2: i32) -> (i32, i32, i32) {
    %c0_i32 = arith.constant 0 : i32
    %c0_i32_0 = arith.constant 0 : i32
    %c0_i32_1 = arith.constant 0 : i32
    %c0_i32_2 = arith.constant 0 : i32
    return %c0_i32, %c0_i32_0, %c0_i32_1 : i32, i32, i32
  }
  func.func @transform_3(%arg0: i32, %arg1: i32, %arg2: i32) -> (i32, i32) {
    %c0_i32 = arith.constant 0 : i32
    %c0_i32_0 = arith.constant 0 : i32
    %c0_i32_1 = arith.constant 0 : i32
    return %c0_i32, %c0_i32_0 : i32, i32
  }
  func.func @transform_4(%arg0: i32, %arg1: i32, %arg2: i32) -> (i32, i32) {
    %c0_i32 = arith.constant 0 : i32
    %c0_i32_0 = arith.constant 0 : i32
    %c0_i32_1 = arith.constant 0 : i32
    return %c0_i32, %c0_i32_0 : i32, i32
  }
  func.func @transform_5(%arg0: i32, %arg1: i32, %arg2: i32) -> (i32, i32, i32, i32, i32) {
    %c0_i32 = arith.constant 0 : i32
    %c0_i32_0 = arith.constant 0 : i32
    %c0_i32_1 = arith.constant 0 : i32
    return %arg0, %c0_i32, %arg1, %c0_i32_0, %arg2 : i32, i32, i32, i32, i32
  }
}

</mosaic_0001>

<bundles_post_ra>
// kernel: rotating_conv_transpose2d.3
= control target key start
LH: loop header
LB: loop body
LE: loop exit
PB: predicated region body
PF: predicated region fallthrough
CT: control target
= control target key end

     0   :  { %s751_s18 = smov 0   ;;  %s753_s19 = smov 0   ;;  %s886_s0 = inlined_call_operand.vmem [shape: bf16[2,2,4,8,64], index: 0, kind: input, shape index: {}]   ;;  %s887_s1 = inlined_call_operand.vmem [shape: bf16[2,4,8,64], index: 1, kind: input, shape index: {}]   ;;  %s888_s2 = inlined_call_operand.vmem [shape: f32[2,8,1], index: 2, kind: input, shape index: {}]   ;;  %s889_s3 = inlined_call_operand.vmem [shape: f32[8,1], index: 3, kind: input, shape index: {}]   ;;  %s890_s4 = inlined_call_operand.vmem [shape: f32[8,1], index: 4, kind: input, shape index: {}]   ;;  %s891_s5 = inlined_call_operand.vmem [shape: f32[2,2,4,8,64], index: 5, kind: output, shape index: {}]  }
   0x1   :  { %s755_s20 = smov 0   ;;  %s757_s21 = smov 0  }
   0x2   :  { %s759_s22 = smov 0   ;;  %s761_s23 = smov 0  }
   0x3   :  { %s763_s24 = smov 0  }
   0x4 LB: > { %s30_s25 = sadd.s32 1, %s710_s22  ;;  %s34_s26 = sadd.s32 1, %s714_s23  ;;  %s718_s24 = sphi %s763_s24, %s15_s24   ;;  %s714_s23 = sphi %s761_s23, %s898_s23   ;;  %s710_s22 = sphi %s759_s22, %s897_s22   ;;  %s706_s21 = sphi %s757_s21, %s896_s21   ;;  %s702_s20 = sphi %s755_s20, %s895_s20   ;;  %s698_s19 = sphi %s753_s19, %s894_s19   ;;  %s694_s18 = sphi %s751_s18, %s893_s18  }
   0x5   : > { %p32_p0 = scmp.ge.s32.totalorder %s30_s25, 4  ;;  %s578_s27 = sadd.s32 4294967295, %s718_s24  }
   0x6   : > { %p52_p1 = scmp.ne.s32.totalorder %s698_s19, %s694_s18  ;;  %p53_p2 = scmp.eq.s32.totalorder %s718_s24, 0 }
   0x7   : > { %s900_s25 = smov (%p32_p0, %s30_s25), 0  ;;  %s902_s26 = smov (!%p32_p0, %s34_s26), %s714_s23 }
   0x8   : > { %p36_p3 = scmp.ge.s32.totalorder %s902_s26, 2  ;;  %p179_p4 = scmp.eq.s32.totalorder %s578_s27, 7 }
   0x9   : > { %s39_s28 = ssub.s32 %s710_s22, %s900_s25  ;;  %p54_p5 = por %p53_p2, %p52_p1 }
   0xa   : > { %s904_s26 = smov (%p36_p3, %s902_s26), 0  ;;  %p799_p6 = por %p179_p4, %p52_p1 }
   0xb   : > { %s38_s30 = ssub.s32 %s714_s23, %s904_s26  ;;  %s45_s7 = sadd.s32 1, %s698_s19 }
   0xc   : > { %s40_s6 = sor.u32 %s39_s28, %s38_s30  ;;  %p581_p8 = scmp.ge.s32.totalorder %s718_s24, 8 }
   0xd   : > { %p43_p7 = scmp.eq.s32.totalorder %s40_s6, 0 }
   0xe   : > { %210 = sbr.rel (%p581_p8) target bundleno = 27 (0x1b), region = 28 }
   0xf   : > { %s807_s8 = scalar_select %p43_p7, %s698_s19, %s45_s7  }
  0x13   : > { %213 = sbr.rel (!%p54_p5) target bundleno = 27 (0x1b), region = 32  ;;  %s215_s9 = sand.u32 (%p54_p5), 1, %s698_s19  }
  0x14   : > { %s583_s10 = sshll.u32 (%p54_p5), %s714_s23, 3  ;;  %s582_s11 = sshll.u32 (%p54_p5), %s215_s9, 3 }
  0x15   : > { %s220_s12 = sadd.s32 (%p54_p5), %s710_s22, %s583_s10  ;;  %s217_s17 = scalar_lea.vmem (%p54_p5), [#allocation2], %s582_s11 }
  0x16   : > { %s584_s13 = sshll.u32 (%p54_p5), %s220_s12, 2 }
  0x17   : > { %s222_s16 = scalar_lea.vmem (%p54_p5), %s886_s0, %s584_s13 }
  0x18   : > { %v239_v0 = vld [vmem:[%s222_s16] sm:$0xf]  ;;  %v241_v1 = vld [vmem:[%s222_s16 + $0x10] sm:$0xf] }
  0x19   : > { %240 = vst [vmem:[%s217_s17] sm:$0xf] %v239_v0 }
  0x1a   : > { %242 = vst [vmem:[%s217_s17 + $0x4] sm:$0xf] %v241_v1 }
  0x1b PF: > { %p585_p9 = scmp.ge.s32.totalorder %s718_s24, 1  ;;  %p283_p10 = scmp.lt.s32.totalorder %s718_s24, 9 }
  0x1d   : > { %p284_p11 = pnand %p585_p9, %p283_p10 }
  0x1e   : > { %s290_s12 = sand.u32 (!%p284_p11), 1, %s694_s18   ;;  %p327_p12 = scmp.lt.s32.totalorder (!%p284_p11), %s706_s21, 1 }
  0x1f   : > { %287 = sbr.rel (%p284_p11) target bundleno = 222 (0xde), region = 77  ;;  %s586_s13 = sshll.u32 (!%p284_p11), %s290_s12, 3 }
  0x20   : > { %s292_s14 = scalar_lea.vmem (!%p284_p11), [#allocation2], %s586_s13  ;;  %p329_p13 = scmp.lt.s32.totalorder (!%p284_p11), %s702_s20, 3 }
  0x21   : > { %s587_s9 = sshll.u32 (!%p284_p11), %s290_s12, 4 }
  0x22   : > { %s326_s10 = scalar_lea.vmem (!%p284_p11), [#allocation3], %s587_s9 }
  0x24   : > { %v342_v2 = vld [vmem:[%s888_s2] sm:$0xff]  ;;  %v720_v4 = vmov 0   ;;  %v343_v5 = vld [vmem:[%s888_s2 + $0x8] sm:$0xff]  ;;  %vm358_vm0 = vcmask 523264   ;;  %s328_s15 = scalar_select %p327_p12, %s706_s21, 1 }
  0x25   : > { %v378_v3 = vld [vmem:[%s889_s3] sm:$0xff]  ;;  %656 = vset.pattern.permute.xlu0 %v720_v4  ;;  %657 = vset.pattern.permute.xlu1 %v720_v4  ;;  %s330_s16 = scalar_select %p329_p13, %s702_s20, 3 }
  0x26   : > { %346 = vperm.xlu0 %656, %v342_v2   ;;  %381 = vperm.xlu1 %657, %v378_v3   ;;  %v385_v6 = vld [vmem:[%s890_s4] sm:$0xff]  ;;  %s588_s17 = sshll.u32 %s328_s15, 2  ;;  %s591_s18 = sshll.u32 (%p799_p6), %s706_s21, 3 }
  0x27   : > { %v596_v7 = vld [vmem:[%s292_s14] sm:$0xff]   ;;  %s335_s27 = sadd.s32 %s588_s17, %s330_s16  ;;  %s440_s11 = sadd.s32 (%p799_p6), %s702_s20, %s591_s18 }
  0x28   : > { %v597_v8 = vunpack.c.l.bf16 %v596_v7  ;;  %v598_v9 = vunpack.c.h.bf16 %v596_v7  ;;  %s589_s28 = sshll.u32 %s335_s27, 2  ;;  %s592_s12 = sshll.u32 (%p799_p6), %s440_s11, 3 }
  0x29   : > { %s337_s7 = scalar_lea.vmem %s887_s1, %s589_s28  ;;  %s442_s15 = scalar_lea.vmem (%p799_p6), %s891_s5, %s592_s12 }
  0x2a   : > { %v356_v10 = vmul.f32 %v597_v8, %v597_v8  ;;  %v357_v11 = vmul.f32 %v598_v9, %v598_v9  ;;  %v374_v39 = vld [vmem:[%s337_s7] sm:$0xf] }
  0x2b   : > { %v375_v44 = vunpack.c.l.bf16 %v374_v39 }
  0x2c   : > { %v359_v12 = vsel %vm358_vm0, %v356_v10, 0.0  ;;  %v360_v13 = vsel %vm358_vm0, %v357_v11, 0.0 }
  0x2d   : > { %v361_v14 = vadd.f32 %v360_v13, %v359_v12 }
  0x2e   : > { %351 = vperm.xlu0 %656, %v343_v5   ;;  %388 = vperm.xlu1 %657, %v385_v6  }
  0x2f   : > { %658 = vrsqrt.f32 %v361_v14  ;;  %vm369_vm1 = vcmp.eq.f32.partialorder %v361_v14, inf  ;;  %v372_v38 = vand.u32 2147483648, %v361_v14  ;;  %vm371_vm3 = vcmp.eq.f32.partialorder %v361_v14, 0.0 }
  0x35   : > { %v659_v17 = vpop.eup %658 }
  0x36   : > { %v363_v21 = vmul.f32 %v659_v17, %v361_v14 }
  0x38   : > { %v364_v26 = vmul.f32 %v659_v17, %v363_v21 }
  0x3a   : > { %v365_v27 = vmul.f32 0.5, %v364_v26 }
  0x3c   : > { %v366_v29 = vsub.f32 1.5, %v365_v27 }
  0x3e   : > { %v367_v32 = vmul.f32 %v659_v17, %v366_v29 }
  0x40   : > { %v368_v35 = vmul.f32 %v367_v32, %v361_v14 }
  0x42   : > { %v370_v41 = vsel %vm369_vm1, %v361_v14, %v368_v35 }
  0x43   : > { %v373_v46 = vsel %vm371_vm3, %v372_v38, %v370_v41 }
  0x44   : > { %v376_v48 = vadd.f32 %v375_v44, %v373_v46 }
  0x46   : > { %v377_v49 = vmul.f32 0.5, %v376_v48 }
  0x98   : > { %v347_v15 = vpop.permute.xlu0 %346  ;;  %v382_v47 = vpop.permute.xlu1 %381 }
  0x99   : > { %v835_v16 = vadd.f32 %v597_v8, %v347_v15  ;;  %v384_v53 = vmul.f32 %v382_v47, %v377_v49 }
  0x9b   : > { %v393_v19 = vmul.f32 %v835_v16, %v835_v16 }
  0x9d   : > { %v395_v23 = vsel %vm358_vm0, %v393_v19, 0.0 }
  0xa0   : > { %v352_v18 = vpop.permute.xlu0 %351  ;;  %v389_v55 = vpop.permute.xlu1 %388 }
  0xa1   : > { %v839_v20 = vadd.f32 %v598_v9, %v352_v18  ;;  %v391_v59 = vadd.f32 %v389_v55, %v384_v53 }
  0xa3   : > { %v394_v22 = vmul.f32 %v839_v20, %v839_v20  ;;  %v392_v1 = vmax.f32 %v391_v59, 0.0 }
  0xa5   : > { %v396_v24 = vsel %vm358_vm0, %v394_v22, 0.0 }
  0xa6   : > { %v397_v25 = vadd.f32 %v396_v24, %v395_v23 }
  0xa8   : > { %660 = vrsqrt.f32 %v397_v25  ;;  %vm405_vm2 = vcmp.eq.f32.partialorder %v397_v25, inf  ;;  %v408_v40 = vand.u32 2147483648, %v397_v25  ;;  %vm407_vm4 = vcmp.eq.f32.partialorder %v397_v25, 0.0 }
  0xae   : > { %v661_v28 = vpop.eup %660 }
  0xaf   : > { %v399_v30 = vmul.f32 %v661_v28, %v397_v25 }
  0xb1   : > { %v400_v31 = vmul.f32 %v661_v28, %v399_v30 }
  0xb3   : > { %v401_v33 = vmul.f32 0.5, %v400_v31 }
  0xb5   : > { %v402_v34 = vsub.f32 1.5, %v401_v33 }
  0xb7   : > { %v403_v36 = vmul.f32 %v661_v28, %v402_v34 }
  0xb9   : > { %v404_v37 = vmul.f32 %v403_v36, %v397_v25 }
  0xbb   : > { %v406_v42 = vsel %vm405_vm2, %v397_v25, %v404_v37 }
  0xbc   : > { %v409_v43 = vsel %vm407_vm4, %v408_v40, %v406_v42 }
  0xbd   : > { %v410_v45 = vadd.f32 1e-08, %v409_v43 }
  0xbf   : > { %662 = vrcp.f32 %v410_v45  ;;  %v422_v54 = vand.u32 2147483648, %v410_v45  ;;  %v420_v57 = vand.u32 2147483647, %v410_v45  ;;  %vm416_vm6 = vweird.f32 %v410_v45 }
  0xc1   : > { %v423_v60 = vor.u32 1.1754944e-38, %v422_v54  ;;  %vm421_vm8 = vcmp.eq.f32.partialorder %v420_v57, 8.507059e+37 }
  0xc5   : > { %v663_v50 = vpop.eup %662 }
  0xc6   : > { %v412_v51 = vmul.f32 %v663_v50, %v410_v45  ;;  %vm417_vm5 = vweird.f32 %v663_v50 }
  0xc7   : > { %vm418_vm7 = vmor %vm416_vm6, %vm417_vm5 }
  0xc8   : > { %v413_v52 = vsub.f32 1.0, %v412_v51 }
  0xca   : > { %v414_v56 = vmul.f32 %v663_v50, %v413_v52 }
  0xcc   : > { %v415_v58 = vadd.f32 %v663_v50, %v414_v56 }
  0xce   : > { %v419_v61 = vsel %vm418_vm7, %v663_v50, %v415_v58 }
  0xcf   : > { %v424_v62 = vsel %vm421_vm8, %v423_v60, %v419_v61 }
  0xd0   : > { %v425_v63 = vmul.f32 %v424_v62, %v835_v16  ;;  %v426_v0 = vmul.f32 %v424_v62, %v839_v20 }
  0xd1   : > { %437 = sbr.rel (!%p799_p6) target bundleno = 222 (0xde), region = 85 }
  0xd2   : > { %v427_v2 = vmul.f32 %v425_v63, %v392_v1  ;;  %v428_v3 = vmul.f32 %v426_v0, %v392_v1 }
  0xd4   : > { %429 = vst.msk [vmem:[%s326_s10] sm:$0xff] %vm358_vm0, %v427_v2 }
  0xd5   : > { %430 = vst.msk [vmem:[%s326_s10 + $0x8] sm:$0xff] %vm358_vm0, %v428_v3 }
  0xdb   : > { %v473_v4 = vld [vmem:[%s326_s10] sm:$0xff] }
  0xdc   : > { %v475_v5 = vld [vmem:[%s326_s10 + $0x8] sm:$0xff]  ;;  %474 = vst [vmem:[%s442_s15] sm:$0xff] %v473_v4 }
  0xdd   : > { %476 = vst [vmem:[%s442_s15 + $0x20] sm:$0xff] %v475_v5 }
  0xde PF: > { %s15_s24 = sadd.s32 1, %s718_s24   ;;  %s893_s18 = smov %s698_s19 }
  0xdf   : > { %p12_p0 = scmp.ge.s32.totalorder %s15_s24, 10   ;;  %s894_s19 = smov %s807_s8 }
  0xe0   : > { %s895_s20 = smov %s710_s22  ;;  %s896_s21 = smov %s714_s23 }
  0xe1   : > { %s897_s22 = smov %s900_s25  ;;  %s898_s23 = smov %s904_s26 }
  0xe2   :  { %14 = sbr.rel (!%p12_p0) target bundleno = 4 (0x4), region = 157 }

// kernel: rotating_conv_transpose2d.2
= control target key start
LH: loop header
LB: loop body
LE: loop exit
PB: predicated region body
PF: predicated region fallthrough
CT: control target
= control target key end

     0   :  { %s791_s15 = smov [#allocation4]   ;;  %s995_s0 = inlined_call_operand.vmem [shape: s32[4,4,2], index: 0, kind: input, shape index: {}]   ;;  %s996_s1 = inlined_call_operand.vmem [shape: f32[6,9,9,4], index: 1, kind: input, shape index: {}]   ;;  %s997_s2 = inlined_call_operand.vmem [shape: f32[4,16,8], index: 2, kind: input, shape index: {}]   ;;  %s998_s3 = inlined_call_operand.vmem [shape: bf16[6,4,8,64], index: 3, kind: output, shape index: {}]  }
   0x1   :  { %s9_s14 = sshll.u32 %s995_s0, 4  ;;  %s10_s14 = int_to_ptr.vmem [resolvable:$true] %s9_s14 }
   0x2   :  { %12 = dma.vmem_to_smem %s10_s14, 256, %s791_s15, [#allocation3] }
   0x3   :  { %769 = dma.done.wait [#allocation3], 256 }
   0x4   :  { %770 = vsyncadd [#allocation3], 4294967040 }
   0x5   :  { %15 = sfence }
   0x6   :  { %s818_s16 = smov 0   ;;  %s820_s17 = smov 0  }
   0x7   :  { %s822_s18 = smov 0   ;;  %s824_s19 = smov 0  }
   0x8   :  { %s826_s20 = smov 0  }
   0x9 LB: > { %s36_s0 = sadd.s32 1, %s781_s18  ;;  %s40_s21 = sadd.s32 1, %s785_s19  ;;  %s789_s20 = sphi %s826_s20, %s21_s20   ;;  %s785_s19 = sphi %s824_s19, %s1002_s19   ;;  %s781_s18 = sphi %s822_s18, %s1001_s18   ;;  %s777_s17 = sphi %s820_s17, %s1000_s17   ;;  %s773_s16 = sphi %s818_s16, %s999_s16  }
   0xa   : > { %p38_p0 = scmp.ge.s32.totalorder %s36_s0, 4  ;;  %p649_p1 = scmp.ge.s32.totalorder %s789_s20, 1 }
   0xb   : > { %p154_p2 = scmp.lt.s32.totalorder %s789_s20, 25 }
   0xc   : > { %s1004_s0 = smov (%p38_p0, %s36_s0), 0  ;;  %s1006_s21 = smov (!%p38_p0, %s40_s21), %s785_s19 }
   0xd   : > { %p155_p3 = pnand %p649_p1, %p154_p2  ;;  %p42_p4 = scmp.ge.s32.totalorder %s1006_s21, 6 }
   0xe   : > { %p187_p5 = scmp.lt.s32.totalorder (!%p155_p3), %s777_s17, 5  ;;  %s675_s22 = sshll.u32 (!%p155_p3), %s773_s16, 9 }
   0xf   : > { %s1008_s21 = smov (%p42_p4, %s1006_s21), 0  ;;  %158 = sbr.rel (%p155_p3) target bundleno = 468 (0x1d4), region = 28 }
  0x10   : > { %s681_s23 = sadd.s32 (!%p155_p3), 384, %s675_s22  ;;  %s677_s28 = sadd.s32 (!%p155_p3), 128, %s675_s22 }
  0x11   : > { %s353_s24 = sld [smem:[#allocation4 + %s681_s23]] (!%p155_p3)  ;;  %s354_s25 = sadd.s32 (!%p155_p3), 1, %s681_s23 }
  0x12   : > { %s355_s27 = sld [smem:[#allocation4 + %s354_s25]] (!%p155_p3)  ;;  %s238_s6 = sadd.s32 (!%p155_p3), 1, %s677_s28 }
  0x13   : > { %s237_s5 = sld [smem:[#allocation4 + %s677_s28]] (!%p155_p3)  ;;  %s679_s7 = sadd.s32 (!%p155_p3), 256, %s675_s22 }
  0x14   : > { %s1010_s17 = smov (!%p187_p5, %s777_s17), 5  ;;  %s239_s8 = sld [smem:[#allocation4 + %s238_s6]]  ;;  %vm226_vm0 = vcmask 31744   ;;  %vm284_vm1 = vcmask 64544   ;;  %vm342_vm2 = vcmask 97344   ;;  %vm400_vm3 = vcmask 130144  }
  0x15   : > { %s691_s26 = smul.u32 144, %s1010_s17  ;;  %s296_s9 = sadd.s32 1, %s679_s7  ;;  %vm419_vm4 = vcmask 130048   ;;  %vm518_vm5 = vcmask 519168  }
  0x16   : > { %s295_s11 = sld [smem:[#allocation4 + %s679_s7]]  ;;  %s792_s25 = smov 12  }
  0x17   : > { %s857_s4 = scalar_lea.vmem %s996_s1, %s691_s26  ;;  %s663_s10 = sshll.u32 %s353_s24, 4 }
  0x18   : > { %s358_s12 = sadd.s32 %s663_s10, %s355_s27  ;;  %s297_s13 = sld [smem:[#allocation4 + %s296_s9]] }
  0x19   : > { %s860_s14 = scalar_lea.vmem %s857_s4, %s358_s12  ;;  %s659_s15 = sshll.u32 %s237_s5, 4 }
  0x1a   : > { %v360_v0 = vld [vmem:[%s860_s14] sm:$0xff]  ;;  %s211_s23 = sld [smem:[#allocation4 + %s675_s22]]  ;;  %s212_s26 = sadd.s32 1, %s675_s22  ;;  %v361_v11 = vld [vmem:[%s860_s14 + $0x10] sm:$0xff] }
  0x1b   : > { %376 = vrot.lane.b32.xlu1 %v360_v0, %s792_s25  ;;  %s242_s28 = sadd.s32 %s659_s15, %s239_s8  ;;  %s213_s29 = sld [smem:[#allocation4 + %s212_s26]]  ;;  %v362_v8 = vld [vmem:[%s860_s14 + $0x20] sm:$0xff]  ;;  %v363_v18 = vld [vmem:[%s860_s14 + $0x30] sm:$0xff] }
  0x1c   : > { %s865_s30 = scalar_lea.vmem %s857_s4, %s242_s28  ;;  %s661_s24 = sshll.u32 %s295_s11, 4  ;;  %v364_v10 = vld [vmem:[%s860_s14 + $0x40] sm:$0xff]  ;;  %v365_v20 = vld [vmem:[%s860_s14 + $0x50] sm:$0xff] }
  0x1d   : > { %v244_v1 = vld [vmem:[%s865_s30] sm:$0xff]  ;;  %s793_s6 = smov 4   ;;  %s794_s9 = smov 8   ;;  %v245_v6 = vld [vmem:[%s865_s30 + $0x10] sm:$0xff] }
  0x1e   : > { %s300_s27 = sadd.s32 %s661_s24, %s297_s13  ;;  %260 = vrot.lane.b32.xlu0 %v244_v1, %s793_s6  ;;  %v248_v2 = vld [vmem:[%s865_s30 + $0x40] sm:$0xff]  ;;  %v247_v14 = vld [vmem:[%s865_s30 + $0x30] sm:$0xff]  ;;  %p192_p6 = scmp.lt.s32.totalorder %s773_s16, 3 }
  0x1f   : > { %v246_v3 = vld [vmem:[%s865_s30 + $0x20] sm:$0xff]  ;;  %268 = vrot.lane.b32.xlu2 %v248_v2, %s793_s6  ;;  %s873_s5 = scalar_lea.vmem %s857_s4, %s300_s27  ;;  %v249_v16 = vld [vmem:[%s865_s30 + $0x50] sm:$0xff]  ;;  %s653_s13 = sshll.u32 %s1010_s17, 2 }
  0x20   : > { %s657_s22 = sshll.u32 %s211_s23, 4  ;;  %v302_v4 = vld [vmem:[%s873_s5] sm:$0xff]  ;;  %v303_v9 = vld [vmem:[%s873_s5 + $0x10] sm:$0xff]  ;;  %s1012_s16 = smov (!%p192_p6, %s773_s16), 3 }
  0x21   : > { %s216_s7 = sadd.s32 %s657_s22, %s213_s29  ;;  %v304_v5 = vld [vmem:[%s873_s5 + $0x20] sm:$0xff]  ;;  %v305_v17 = vld [vmem:[%s873_s5 + $0x30] sm:$0xff] }
  0x22   : > { %s877_s8 = scalar_lea.vmem %s857_s4, %s216_s7  ;;  %v306_v7 = vld [vmem:[%s873_s5 + $0x40] sm:$0xff]  ;;  %v307_v19 = vld [vmem:[%s873_s5 + $0x50] sm:$0xff]  ;;  %s674_s4 = sshll.u32 %s1012_s16, 4 }
  0x23   : > { %264 = vrot.lane.b32.xlu1 %v246_v3, %s793_s6  ;;  %v308_v12 = vld [vmem:[%s873_s5 + $0x60] sm:$0xff]  ;;  %v309_v21 = vld [vmem:[%s873_s5 + $0x70] sm:$0xff]  ;;  %s196_s12 = scalar_lea.vmem %s997_s2, %s674_s4 }
  0x24   : > { %v250_v13 = vld [vmem:[%s865_s30 + $0x60] sm:$0xff]  ;;  %v251_v22 = vld [vmem:[%s865_s30 + $0x70] sm:$0xff]  ;;  %v418_v28 = vld [vmem:[%s196_s12 + $0x8] sm:$0xff] }
  0x25   : > { %v366_v15 = vld [vmem:[%s860_s14 + $0x60] sm:$0xff]  ;;  %v367_v23 = vld [vmem:[%s860_s14 + $0x70] sm:$0xff]  ;;  %458 = vmatpush.msra.mxu0 %v418_v28  ;;  %685 = vmatpush.msra.mxu1 %v418_v28  ;;  %s205_s14 = sadd.s32 %s653_s13, %s1012_s16 }
  0x26   : > { %318 = vrot.lane.b32.xlu0 %v302_v4, %s794_s9  ;;  %v218_v24 = vld [vmem:[%s877_s8] sm:$0xff]  ;;  %v219_v29 = vld [vmem:[%s877_s8 + $0x10] sm:$0xff]  ;;  %686 = vmatpush.msra.mxu2 %v418_v28  ;;  %s654_s15 = sshll.u32 %s205_s14, 2 }
  0x27   : > { %322 = vrot.lane.b32.xlu2 %v304_v5, %s794_s9  ;;  %227 = vst.msk [vmem:[#allocation2] sm:$0xff] %vm226_vm0, %v218_v24  ;;  %v222_v25 = vld [vmem:[%s877_s8 + $0x40] sm:$0xff]  ;;  %687 = vmatpush.msra.mxu3 %v418_v28  ;;  %v221_v37 = vld [vmem:[%s877_s8 + $0x30] sm:$0xff]  ;;  %s207_s26 = scalar_lea.vmem %s998_s3, %s654_s15 }
  0x28   : > { %231 = vst.msk [vmem:[#allocation2 + $0x20] sm:$0xff] %vm226_vm0, %v222_v25  ;;  %v220_v26 = vld [vmem:[%s877_s8 + $0x20] sm:$0xff]  ;;  %v223_v42 = vld [vmem:[%s877_s8 + $0x50] sm:$0xff] }
  0x29   : > { %229 = vst.msk [vmem:[#allocation2 + $0x10] sm:$0xff] %vm226_vm0, %v220_v26  ;;  %v417_v30 = vld [vmem:[%s196_s12] sm:$0xff]  ;;  %v225_v49 = vld [vmem:[%s877_s8 + $0x70] sm:$0xff] }
  0x2a   : > { %228 = vst.msk [vmem:[#allocation2 + $0x8] sm:$0xff] %vm226_vm0, %v219_v29  ;;  %459 = vmatpush.msra.mxu0 %v417_v30  ;;  %688 = vmatpush.msra.mxu1 %v417_v30  ;;  %v224_v34 = vld [vmem:[%s877_s8 + $0x60] sm:$0xff] }
  0x2b   : > { %262 = vrot.lane.b32.xlu1 %v245_v6, %s793_s6  ;;  %689 = vmatpush.msra.mxu2 %v417_v30  ;;  %233 = vst.msk [vmem:[#allocation2 + $0x30] sm:$0xff] %vm226_vm0, %v224_v34 }
  0x2c   : > { %690 = vmatpush.msra.mxu3 %v417_v30  ;;  %230 = vst.msk [vmem:[#allocation2 + $0x18] sm:$0xff] %vm226_vm0, %v221_v37 }
  0x2d   : > { %232 = vst.msk [vmem:[#allocation2 + $0x28] sm:$0xff] %vm226_vm0, %v223_v42 }
  0x2e   : > { %326 = vrot.lane.b32.xlu0 %v306_v7, %s794_s9  ;;  %234 = vst.msk [vmem:[#allocation2 + $0x38] sm:$0xff] %vm226_vm0, %v225_v49 }
  0x2f   : > { %380 = vrot.lane.b32.xlu2 %v362_v8, %s792_s25 }
  0x33   : > { %320 = vrot.lane.b32.xlu1 %v303_v9, %s794_s9 }
  0x36   : > { %384 = vrot.lane.b32.xlu0 %v364_v10, %s792_s25 }
  0x37   : > { %378 = vrot.lane.b32.xlu2 %v361_v11, %s792_s25 }
  0x3b   : > { %330 = vrot.lane.b32.xlu1 %v308_v12, %s794_s9 }
  0x3e   : > { %272 = vrot.lane.b32.xlu0 %v250_v13, %s793_s6 }
  0x3f   : > { %266 = vrot.lane.b32.xlu2 %v247_v14, %s793_s6 }
  0x43   : > { %388 = vrot.lane.b32.xlu1 %v366_v15, %s792_s25 }
  0x46   : > { %270 = vrot.lane.b32.xlu0 %v249_v16, %s793_s6 }
  0x47   : > { %324 = vrot.lane.b32.xlu2 %v305_v17, %s794_s9 }
  0x4b   : > { %382 = vrot.lane.b32.xlu1 %v363_v18, %s792_s25 }
  0x4e   : > { %328 = vrot.lane.b32.xlu0 %v307_v19, %s794_s9 }
  0x4f   : > { %386 = vrot.lane.b32.xlu2 %v365_v20, %s792_s25 }
  0x53   : > { %332 = vrot.lane.b32.xlu1 %v309_v21, %s794_s9 }
  0x56   : > { %274 = vrot.lane.b32.xlu0 %v251_v22, %s793_s6 }
  0x57   : > { %390 = vrot.lane.b32.xlu2 %v367_v23, %s792_s25 }
  0x79   : > { %v269_v27 = vpop.permute.xlu2 %268 }
  0x7a   : > { %289 = vst.msk [vmem:[#allocation2 + $0x20] sm:$0xff] %vm284_vm1, %v269_v27 }
  0x81   : > { %v323_v31 = vpop.permute.xlu2 %322 }
  0x89   : > { %v381_v32 = vpop.permute.xlu2 %380 }
  0x8d   : > { %v377_v33 = vpop.permute.xlu1 %376 }
  0x90   : > { %v261_v35 = vpop.permute.xlu0 %260 }
  0x91   : > { %285 = vst.msk [vmem:[#allocation2] sm:$0xff] %vm284_vm1, %v261_v35  ;;  %v379_v36 = vpop.permute.xlu2 %378 }
  0x95   : > { %v265_v38 = vpop.permute.xlu1 %264 }
  0x96   : > { %287 = vst.msk [vmem:[#allocation2 + $0x10] sm:$0xff] %vm284_vm1, %v265_v38 }
  0x97   : > { %345 = vst.msk [vmem:[#allocation2 + $0x10] sm:$0xff] %vm342_vm2, %v323_v31 }
  0x98   : > { %403 = vst.msk [vmem:[#allocation2 + $0x10] sm:$0xff] %vm400_vm3, %v381_v32  ;;  %v319_v39 = vpop.permute.xlu0 %318 }
  0x99   : > { %343 = vst.msk [vmem:[#allocation2] sm:$0xff] %vm342_vm2, %v319_v39  ;;  %v267_v40 = vpop.permute.xlu2 %266 }
  0x9a   : > { %401 = vst.msk [vmem:[#allocation2] sm:$0xff] %vm400_vm3, %v377_v33 }
  0x9b   : > { %288 = vst.msk [vmem:[#allocation2 + $0x18] sm:$0xff] %vm284_vm1, %v267_v40 }
  0x9d   : > { %v263_v41 = vpop.permute.xlu1 %262 }
  0x9e   : > { %286 = vst.msk [vmem:[#allocation2 + $0x8] sm:$0xff] %vm284_vm1, %v263_v41 }
  0x9f   : > { %v411_v43 = vld [vmem:[#allocation2 + $0x10] sm:$0xff] }
  0xa0   : > { %666 = vmatmul.msk.f32.vlgmr.msra.gmra.mxu1 %vm419_vm4, %v411_v43  ;;  %v327_v44 = vpop.permute.xlu0 %326 }
  0xa1   : > { %347 = vst.msk [vmem:[#allocation2 + $0x20] sm:$0xff] %vm342_vm2, %v327_v44  ;;  %v409_v45 = vld [vmem:[#allocation2] sm:$0xff]  ;;  %v325_v46 = vpop.permute.xlu2 %324 }
  0xa2   : > { %664 = vmatmul.msk.f32.vlgmr.msra.gmra.mxu0 %vm419_vm4, %v409_v45  ;;  %346 = vst.msk [vmem:[#allocation2 + $0x18] sm:$0xff] %vm342_vm2, %v325_v46 }
  0xa5   : > { %v321_v47 = vpop.permute.xlu1 %320 }
  0xa6   : > { %344 = vst.msk [vmem:[#allocation2 + $0x8] sm:$0xff] %vm342_vm2, %v321_v47 }
  0xa7   : > { %402 = vst.msk [vmem:[#allocation2 + $0x8] sm:$0xff] %vm400_vm3, %v379_v36 }
  0xa8   : > { %v385_v48 = vpop.permute.xlu0 %384 }
  0xa9   : > { %405 = vst.msk [vmem:[#allocation2 + $0x20] sm:$0xff] %vm400_vm3, %v385_v48  ;;  %v387_v58 = vpop.permute.xlu2 %386 }
  0xad   : > { %v331_v50 = vpop.permute.xlu1 %330 }
  0xae   : > { %v410_v51 = vld [vmem:[#allocation2 + $0x8] sm:$0xff] }
  0xaf   : > { %665 = vmatmul.msk.f32.gmra.mxu0 %vm419_vm4, %v410_v51 }
  0xb0   : > { %v273_v52 = vpop.permute.xlu0 %272  ;;  %v413_v53 = vld [vmem:[#allocation2 + $0x20] sm:$0xff] }
  0xb1   : > { %291 = vst.msk [vmem:[#allocation2 + $0x30] sm:$0xff] %vm284_vm1, %v273_v52  ;;  %668 = vmatmul.msk.f32.vlgmr.msra.gmra.mxu2 %vm419_vm4, %v413_v53  ;;  %v391_v63 = vpop.permute.xlu2 %390 }
  0xb2   : > { %349 = vst.msk [vmem:[#allocation2 + $0x30] sm:$0xff] %vm342_vm2, %v331_v50 }
  0xb5   : > { %v389_v54 = vpop.permute.xlu1 %388 }
  0xb6   : > { %407 = vst.msk [vmem:[#allocation2 + $0x30] sm:$0xff] %vm400_vm3, %v389_v54 }
  0xb8   : > { %v271_v55 = vpop.permute.xlu0 %270 }
  0xb9   : > { %290 = vst.msk [vmem:[#allocation2 + $0x28] sm:$0xff] %vm284_vm1, %v271_v55 }
  0xbd   : > { %v383_v56 = vpop.permute.xlu1 %382  ;;  %v415_v57 = vld [vmem:[#allocation2 + $0x30] sm:$0xff] }
  0xbe   : > { %404 = vst.msk [vmem:[#allocation2 + $0x18] sm:$0xff] %vm400_vm3, %v383_v56  ;;  %670 = vmatmul.msk.f32.vlgmr.msra.gmra.mxu3 %vm419_vm4, %v415_v57 }
  0xc0   : > { %v329_v59 = vpop.permute.xlu0 %328 }
  0xc1   : > { %348 = vst.msk [vmem:[#allocation2 + $0x28] sm:$0xff] %vm342_vm2, %v329_v59 }
  0xc2   : > { %406 = vst.msk [vmem:[#allocation2 + $0x28] sm:$0xff] %vm400_vm3, %v387_v58 }
  0xc5   : > { %v412_v60 = vld [vmem:[#allocation2 + $0x18] sm:$0xff]  ;;  %v333_v61 = vpop.permute.xlu1 %332 }
  0xc6   : > { %667 = vmatmul.msk.f32.gmra.mxu1 %vm419_vm4, %v412_v60 }
  0xc8   : > { %v275_v62 = vpop.permute.xlu0 %274 }
  0xc9   : > { %v414_v0 = vld [vmem:[#allocation2 + $0x28] sm:$0xff]  ;;  %292 = vst.msk [vmem:[#allocation2 + $0x38] sm:$0xff] %vm284_vm1, %v275_v62 }
  0xca   : > { %669 = vmatmul.msk.f32.gmra.mxu2 %vm419_vm4, %v414_v0  ;;  %350 = vst.msk [vmem:[#allocation2 + $0x38] sm:$0xff] %vm342_vm2, %v333_v61 }
  0xcb   : > { %408 = vst.msk [vmem:[#allocation2 + $0x38] sm:$0xff] %vm400_vm3, %v391_v63 }
  0xd2   : > { %v416_v1 = vld [vmem:[#allocation2 + $0x38] sm:$0xff] }
  0xd3   : > { %671 = vmatmul.msk.f32.gmra.mxu3 %vm419_vm4, %v416_v1 }
 0x11d   : > { %v467_v4 = vpop.f32.mrf.mxu1 }
 0x11f   : > { %v461_v2 = vpop.f32.mrf.mxu0 }
 0x120   : > { %485 = vxpose.xlu0.b32.start [1/8] (short) (narrow) %v461_v2, 8 }
 0x12c   : > { %v464_v3 = vpop.f32.mrf.mxu0 }
 0x12d   : > { %486 = vxpose.xlu0.b32.cont [2/8] (short) (narrow) %v464_v3, 8 }
 0x134   : > { %v473_v6 = vpop.f32.mrf.mxu2 }
 0x135   : > { %487 = vxpose.xlu0.b32.cont [3/8] (short) (narrow) %v467_v4, 8 }
 0x141   : > { %v479_v8 = vpop.f32.mrf.mxu3 }
 0x143   : > { %v470_v5 = vpop.f32.mrf.mxu1 }
 0x144   : > { %488 = vxpose.xlu0.b32.cont [4/8] (short) (narrow) %v470_v5, 8 }
 0x14c   : > { %489 = vxpose.xlu0.b32.cont [5/8] (short) (narrow) %v473_v6, 8 }
 0x14d   : > { %v476_v7 = vpop.f32.mrf.mxu2 }
 0x154   : > { %490 = vxpose.xlu0.b32.cont [6/8] (short) (narrow) %v476_v7, 8 }
 0x156   : > { %v482_v9 = vpop.f32.mrf.mxu3 }
 0x15c   : > { %491 = vxpose.xlu0.b32.cont [7/8] (short) (narrow) %v479_v8, 8 }
 0x164   : > { %492 = vxpose.xlu0.b32.end [8/8] (short) (narrow) %v482_v9, 8 }
 0x1d0   : > { %v501_v10 = vpop.trf.xlu0 }
 0x1d1   : > { %v517_v11 = vpack.c.bf16 %v501_v10, %v501_v10 }
 0x1d3   : > { %519 = vst.msk [vmem:[%s207_s26] sm:$0xf] %vm518_vm5, %v517_v11 }
 0x1d4 PF: > { %s21_s20 = sadd.s32 1, %s789_s20   ;;  %s999_s16 = smov %s781_s18 }
 0x1d5   : > { %p18_p7 = scmp.ge.s32.totalorder %s21_s20, 26   ;;  %s1000_s17 = smov %s785_s19 }
 0x1d6   : > { %s1001_s18 = smov %s1004_s0  ;;  %s1002_s19 = smov %s1008_s21 }
 0x1d7   :  { %20 = sbr.rel (!%p18_p7) target bundleno = 9 (0x9), region = 65 }

</bundles_post_ra>
